<compile_context>
chip_gen: v7x
topology: tpu7x:2x2x1
jax: 0.10.0
libtpu: 0.0.40
codegen_flags: <defaults>
</compile_context>

<pallas_src>
from functools import partial
import math

import jax
import jax.numpy as jnp
from jax.experimental import pallas as pl
from jax.experimental.pallas import tpu as pltpu


def _vmem_limit_bytes():
    # v5e/v6e: 128 MiB physical VMEM -> allow large resident blocks.
    # v7x: 64 MiB physical -> keep headroom (<= ~48 MiB).
    try:
        phys = pltpu.get_tpu_info().vmem_capacity_bytes
    except Exception:
        phys = 64 * 1024 * 1024
    return int(min(96 * 1024 * 1024, max(32 * 1024 * 1024, (phys * 3) // 4)))


VMEM_LIMIT = _vmem_limit_bytes()


# ----------------------------------------------------------------------------
# small helpers
# ----------------------------------------------------------------------------
def layer_norm(x, gamma, beta, eps=1e-12):
    mu = x.mean(-1, keepdims=True)
    var = ((x - mu) ** 2).mean(-1, keepdims=True)
    return (x - mu) * jax.lax.rsqrt(var + eps) * gamma + beta


def _ln(x, g, b, eps=1e-12):
    # in-kernel layer norm, f32 math
    mu = x.mean(-1, keepdims=True)
    var = ((x - mu) ** 2).mean(-1, keepdims=True)
    return (x - mu) * jax.lax.rsqrt(var + eps) * g + b


# ----------------------------------------------------------------------------
# One-time parameter prep (hoisted out of the per-forward path):
#   * fused, head-major, pre-scaled, bf16 QKV weight (nh, H, 3*hd)
#   * per-head WO weight (nh, hd, H) bf16
#   * bf16 FFN weights, reshaped biases / LN params
#   * conv weight (K, H, F) bf16, fc weight lane-padded (F, CP) bf16
# ----------------------------------------------------------------------------
def prepare_params(params):
    b16 = jnp.bfloat16
    bert = params["bert"]
    H = bert["word_emb"].shape[1]
    nh = bert["nheads"]
    hd = H // nh
    scale = 1.0 / math.sqrt(hd)

    layers = []
    for lp in bert["layers"]:
        wq = lp["wq"] * scale            # fold score scale into Wq / bq
        bq = lp["bq"] * scale
        wqkv_h = jnp.stack(
            [jnp.concatenate([wq[:, n * hd:(n + 1) * hd],
                              lp["wk"][:, n * hd:(n + 1) * hd],
                              lp["wv"][:, n * hd:(n + 1) * hd]], axis=1)
             for n in range(nh)], axis=0).astype(b16)              # (nh, H, 3hd)
        bqkv_h = jnp.stack(
            [jnp.concatenate([bq[n * hd:(n + 1) * hd],
                              lp["bk"][n * hd:(n + 1) * hd],
                              lp["bv"][n * hd:(n + 1) * hd]])
             for n in range(nh)], axis=0).reshape(nh, 1, 3 * hd)    # (nh, 1, 3hd) f32
        I = lp["wi"].shape[1]
        layers.append({
            "wqkv": wqkv_h, "bqkv": bqkv_h,
            "wo": lp["wo"].reshape(nh, hd, H).astype(b16),          # (nh, hd, H)
            "bo": lp["bo"].reshape(1, H),
            "ln1_g": lp["ln1_g"].reshape(1, H), "ln1_b": lp["ln1_b"].reshape(1, H),
            "wi": lp["wi"].astype(b16), "bi": lp["bi"].reshape(1, I),
            "wout": lp["wout"].astype(b16), "bout": lp["bout"].reshape(1, H),
            "ln2_g": lp["ln2_g"].reshape(1, H), "ln2_b": lp["ln2_b"].reshape(1, H),
        })

    K = params["ksize"]
    F = params["conv_w"].shape[-1]
    C = params["fc_w"].shape[-1]
    CP = pl.cdiv(C, 128) * 128                                       # lane-dense logits

    return {
        "bert": {
            "nheads": nh,
            "word_emb": bert["word_emb"], "pos_emb": bert["pos_emb"],
            "type_emb": bert["type_emb"],
            "emb_ln_g": bert["emb_ln_g"], "emb_ln_b": bert["emb_ln_b"],
            "layers": layers,
        },
        "conv_w": params["conv_w"].astype(b16),                      # (K, H, F)
        "conv_b": params["conv_b"].reshape(1, F).astype(jnp.float32),
        "fc_w": jnp.zeros((F, CP), b16).at[:, :C].set(params["fc_w"].astype(b16)),
        "fc_b": jnp.zeros((1, CP), jnp.float32).at[:, :C].set(params["fc_b"]),
        "ksize": K,
        "num_labels": C,
    }


# ----------------------------------------------------------------------------
# Pallas kernel: one full transformer encoder layer, fused.
# Grid over batch (parallel); all intermediates stay in VMEM / vregs.
# Attention is head-batched (nh, S, *) dot_generals — no per-head unroll,
# no concat.  bf16 MXU operands, f32 accumulation; LN / softmax / GELU f32.
# Input and output activations are bf16 (HBM bandwidth).
# ----------------------------------------------------------------------------
def _encoder_layer_kernel(x_ref, mask_ref, wqkv_ref, bqkv_ref, wo_ref, bo_ref,
                          g1_ref, b1_ref, wi_ref, bi_ref, wout_ref, bout_ref,
                          g2_ref, b2_ref, o_ref, *, nh):
    S, H = x_ref.shape[1], x_ref.shape[2]
    hd = H // nh

    xb = x_ref[0]                                   # (S, H) bf16
    x = xb.astype(jnp.float32)                      # f32 for residual / LN math

    # Head-batched QKV: (nh, S, H) @ (nh, H, 3hd) -> (nh, S, 3hd); the score
    # scale 1/sqrt(hd) is already folded into the Q columns of wqkv/bqkv.
    qkv = jax.lax.dot_general(
        jnp.broadcast_to(xb[None], (nh, S, H)), wqkv_ref[...],
        (((2,), (1,)), ((0,), (0,))), preferred_element_type=jnp.float32)
    qkv = qkv + bqkv_ref[...]                       # (nh, S, 3hd) f32
    q = qkv[..., :hd]
    k = qkv[..., hd:2 * hd]
    v = qkv[..., 2 * hd:]

    bias = mask_ref[...]                            # (1, 1, S) additive key mask

    # scores: (nh, S, S), f32; softmax in f32 with exact divide.
    s = jax.lax.dot_general(q.astype(jnp.bfloat16), k.astype(jnp.bfloat16),
                            (((2,), (2,)), ((0,), (0,))),
                            preferred_element_type=jnp.float32) + bias
    m = s.max(-1, keepdims=True)
    e = jnp.exp(s - m)
    p = e / e.sum(-1, keepdims=True)

    # PV: (nh, S, hd)
    ctx = jax.lax.dot_general(p.astype(jnp.bfloat16), v.astype(jnp.bfloat16),
                              (((2,), (1,)), ((0,), (0,))),
                              preferred_element_type=jnp.float32)

    # Per-head output projection, summed over heads: (nh,S,hd)@(nh,hd,H)->(S,H).
    attn = jax.lax.dot_general(ctx.astype(jnp.bfloat16), wo_ref[...],
                               (((2,), (1,)), ((0,), (0,))),
                               preferred_element_type=jnp.float32).sum(0)
    attn = attn + bo_ref[...]
    x1 = _ln(x + attn, g1_ref[...], b1_ref[...])

    # FFN (kept as two big matmuls).
    hmid = jnp.dot(x1.astype(jnp.bfloat16), wi_ref[...],
                   preferred_element_type=jnp.float32) + bi_ref[...]
    hmid = jax.nn.gelu(hmid, approximate=True)
    ffn = jnp.dot(hmid.astype(jnp.bfloat16), wout_ref[...],
                  preferred_element_type=jnp.float32) + bout_ref[...]
    o_ref[...] = _ln(x1 + ffn, g2_ref[...], b2_ref[...]).astype(o_ref.dtype)[None]


def encoder_layer(lp, x, mask_bias, nh):
    B, S, H = x.shape
    hd = H // nh
    I = lp["wi"].shape[1]

    rep2 = lambda b: (0, 0)    # replicated (weight) blocks
    rep3 = lambda b: (0, 0, 0)
    # TODO(synk): at full BERT size add pipeline_mode=pl.Buffered(1) on the
    #             replicated weight specs and a flash-style seq tile.
    return pl.pallas_call(
        partial(_encoder_layer_kernel, nh=nh),
        out_shape=jax.ShapeDtypeStruct((B, S, H), jnp.bfloat16),
        grid=(B,),
        in_specs=[
            pl.BlockSpec((1, S, H), lambda b: (b, 0, 0)),        # x (bf16)
            pl.BlockSpec((1, 1, S), lambda b: (b, 0, 0)),        # mask bias (f32)
            pl.BlockSpec((nh, H, 3 * hd), rep3),                 # wqkv heads (bf16)
            pl.BlockSpec((nh, 1, 3 * hd), rep3),                 # bqkv heads (f32)
            pl.BlockSpec((nh, hd, H), rep3),                     # wo heads (bf16)
            pl.BlockSpec((1, H), rep2),                          # bo
            pl.BlockSpec((1, H), rep2),                          # ln1 gamma
            pl.BlockSpec((1, H), rep2),                          # ln1 beta
            pl.BlockSpec((H, I), rep2),                          # wi (bf16)
            pl.BlockSpec((1, I), rep2),                          # bi
            pl.BlockSpec((I, H), rep2),                          # wout (bf16)
            pl.BlockSpec((1, H), rep2),                          # bout
            pl.BlockSpec((1, H), rep2),                          # ln2 gamma
            pl.BlockSpec((1, H), rep2),                          # ln2 beta
        ],
        out_specs=pl.BlockSpec((1, S, H), lambda b: (b, 0, 0)),
        compiler_params=pltpu.CompilerParams(
            dimension_semantics=("parallel",),
            vmem_limit_bytes=VMEM_LIMIT),
    )(x, mask_bias, lp["wqkv"], lp["bqkv"], lp["wo"], lp["bo"],
      lp["ln1_g"], lp["ln1_b"], lp["wi"], lp["bi"], lp["wout"], lp["bout"],
      lp["ln2_g"], lp["ln2_b"])


# ----------------------------------------------------------------------------
# Pallas kernel: fused Conv2d((K, hidden), pad=(K//2, 0)) + squeeze + permute
# + Linear(num_filters -> num_labels).
# Conv is K per-tap (TB*S, H) @ (H, F) matmuls (full contraction depth H) with
# row-shifted accumulation of the (S, F) partials — no K-fold im2col copy.
# Logits are written lane-dense (padded to a 128 multiple) and sliced outside.
# ----------------------------------------------------------------------------
def _conv_fc_kernel(x_ref, wconv_ref, bconv_ref, wfc_ref, bfc_ref, o_ref, *, K):
    TB, S, H = x_ref.shape
    F = wconv_ref.shape[-1]
    pad = K // 2
    x2 = x_ref[...].reshape(TB * S, H)                  # (TB*S, H) bf16

    conv = None
    for dk in range(K):                                 # static unroll, K tiny
        y = jnp.dot(x2, wconv_ref[dk],
                    preferred_element_type=jnp.float32).reshape(TB, S, F)
        shift = dk - pad                                # out[:, s] += y[:, s+shift]
        if shift < 0:
            y = jnp.concatenate(
                [jnp.zeros((TB, -shift, F), y.dtype), y[:, :S + shift]], axis=1)
        elif shift > 0:
            y = jnp.concatenate(
                [y[:, shift:], jnp.zeros((TB, shift, F), y.dtype)], axis=1)
        conv = y if conv is None else conv + y
    conv = conv.reshape(TB * S, F) + bconv_ref[...]     # (TB*S, F) f32

    logits = jnp.dot(conv.astype(jnp.bfloat16), wfc_ref[...],
                     preferred_element_type=jnp.float32) + bfc_ref[...]
    o_ref[...] = logits.reshape(TB, S, -1)


def conv_fc(seq_out, wconv, bconv, wfc, bfc, K, *, block_b=None):
    """seq_out: (B, S, H) bf16 -> padded logits (B, S, CP) f32."""
    B, S, H = seq_out.shape
    assert K % 2 == 1, "even kernel_size changes PyTorch output length; odd K only"
    F = wconv.shape[-1]
    CP = wfc.shape[-1]

    if block_b is None:
        # >= 2 parallel grid steps so both v7x TensorCores get work (4+ preferred).
        target_steps = 4 if B >= 4 else (2 if B >= 2 else 1)
        block_b = max(1, B // target_steps)
    TB = block_b
    while B % TB:
        TB -= 1

    return pl.pallas_call(
        partial(_conv_fc_kernel, K=K),
        out_shape=jax.ShapeDtypeStruct((B, S, CP), jnp.float32),
        grid=(B // TB,),
        in_specs=[
            pl.BlockSpec((TB, S, H), lambda b: (b, 0, 0)),   # activations (bf16)
            pl.BlockSpec((K, H, F), lambda b: (0, 0, 0)),    # conv taps (bf16)
            pl.BlockSpec((1, F), lambda b: (0, 0)),          # conv bias (f32)
            pl.BlockSpec((F, CP), lambda b: (0, 0)),         # fc weight (bf16, padded)
            pl.BlockSpec((1, CP), lambda b: (0, 0)),         # fc bias (f32, padded)
        ],
        out_specs=pl.BlockSpec((TB, S, CP), lambda b: (b, 0, 0)),
        compiler_params=pltpu.CompilerParams(
            dimension_semantics=("parallel",),
            vmem_limit_bytes=VMEM_LIMIT),
    )(seq_out, wconv, bconv, wfc, bfc)


# ----------------------------------------------------------------------------
# Mini-BERT (deterministic random weights).  Embedding lookup / embedding-LN
# stay in plain JAX; each encoder layer is one fused Pallas kernel; inter-layer
# activations are bf16.
# ----------------------------------------------------------------------------
def bert_forward(p, input_ids, attention_mask):
    B, S = input_ids.shape
    x = (p["word_emb"][input_ids]
         + p["pos_emb"][jnp.arange(S)][None]
         + p["type_emb"][0][None, None])
    x = layer_norm(x, p["emb_ln_g"], p["emb_ln_b"]).astype(jnp.bfloat16)
    mask_bias = ((1.0 - attention_mask.astype(jnp.float32)) * -1e9).reshape(B, 1, S)
    for lp in p["layers"]:
        x = encoder_layer(lp, x, mask_bias, p["nheads"])
    return x  # last_hidden_state, (B, S, H) bf16


def bert_cnn_forward(prepped, input_ids, attention_mask):
    seq_out = bert_forward(prepped["bert"], input_ids, attention_mask)
    logits = conv_fc(seq_out, prepped["conv_w"], prepped["conv_b"],
                     prepped["fc_w"], prepped["fc_b"], prepped["ksize"])
    return logits[:, :, :prepped["num_labels"]], seq_out


if __name__ == "__main__":
    # Small shapes consistent with the module's forward.
    B, S = 2, 8
    VOCAB, HIDDEN, NHEADS, NLAYERS, INTER, MAXPOS = 100, 32, 2, 2, 64, 16
    KSIZE, NFILT, NLABELS = 3, 128, 2

    root = jax.random.PRNGKey(0)
    key_iter = iter(jax.random.split(root, 128))

    def nxt():
        return next(key_iter)

    def w(shape):
        return jax.random.normal(nxt(), shape, jnp.float32) * 0.02

    bert_params = {
        "nheads": NHEADS,
        "word_emb": w((VOCAB, HIDDEN)),
        "pos_emb": w((MAXPOS, HIDDEN)),
        "type_emb": w((2, HIDDEN)),
        "emb_ln_g": jnp.ones((HIDDEN,), jnp.float32),
        "emb_ln_b": jnp.zeros((HIDDEN,), jnp.float32),
        "layers": [
            {
                "wq": w((HIDDEN, HIDDEN)), "bq": jnp.zeros((HIDDEN,), jnp.float32),
                "wk": w((HIDDEN, HIDDEN)), "bk": jnp.zeros((HIDDEN,), jnp.float32),
                "wv": w((HIDDEN, HIDDEN)), "bv": jnp.zeros((HIDDEN,), jnp.float32),
                "wo": w((HIDDEN, HIDDEN)), "bo": jnp.zeros((HIDDEN,), jnp.float32),
                "ln1_g": jnp.ones((HIDDEN,), jnp.float32),
                "ln1_b": jnp.zeros((HIDDEN,), jnp.float32),
                "wi": w((HIDDEN, INTER)), "bi": jnp.zeros((INTER,), jnp.float32),
                "wout": w((INTER, HIDDEN)), "bout": jnp.zeros((HIDDEN,), jnp.float32),
                "ln2_g": jnp.ones((HIDDEN,), jnp.float32),
                "ln2_b": jnp.zeros((HIDDEN,), jnp.float32),
            }
            for _ in range(NLAYERS)
        ],
    }

    params = {
        "bert": bert_params,
        # PyTorch Conv2d weight (F, 1, K, H) stored here as (K, H, F).
        "conv_w": w((KSIZE, HIDDEN, NFILT)),
        "conv_b": w((NFILT,)),
        # PyTorch Linear weight (C, F) stored here transposed as (F, C).
        "fc_w": w((NFILT, NLABELS)),
        "fc_b": w((NLABELS,)),
        "ksize": KSIZE,
    }

    input_ids = jax.random.randint(nxt(), (B, S), 0, VOCAB, dtype=jnp.int32)
    attention_mask = jnp.concatenate(
        [jnp.ones((B, S - 2), jnp.int32), jnp.zeros((B, 2), jnp.int32)], axis=1)

    prepped = prepare_params(params)                 # one-time weight prep
    fwd = jax.jit(lambda ids, m: bert_cnn_forward(prepped, ids, m))

    logits, seq_out = fwd(input_ids, attention_mask)
    logits = jax.block_until_ready(logits)
    assert logits.shape == (B, S, NLABELS)

    # Sanity-check the fused conv+fc kernel against a plain-JAX reference that
    # uses the same bf16-operand / f32-accumulate recipe on the same seq_out.
    pad = KSIZE // 2
    x32 = seq_out.astype(jnp.float32)
    xp = jnp.pad(x32, ((0, 0), (pad, pad), (0, 0)))
    win = jnp.concatenate([xp[:, dk:dk + S] for dk in range(KSIZE)], axis=-1)
    w2d = params["conv_w"].reshape(KSIZE * HIDDEN, NFILT)
    conv_ref = jnp.einsum("bsk,kf->bsf",
                          win.astype(jnp.bfloat16), w2d.astype(jnp.bfloat16),
                          preferred_element_type=jnp.float32) + params["conv_b"]
    ref = jnp.einsum("bsf,fc->bsc",
                     conv_ref.astype(jnp.bfloat16),
                     params["fc_w"].astype(jnp.bfloat16),
                     preferred_element_type=jnp.float32) + params["fc_b"]
    assert jnp.allclose(logits, ref, atol=2e-3, rtol=2e-2), "conv+fc kernel mismatch"

    print("KERNEL_OK")
</pallas_src>

<mosaic_0001>
module attributes {stable_mosaic.version = 11 : i64} {
  func.func @_conv_fc_kernel(%arg0: i32, %arg1: memref<1x8x32xbf16, #tpu.memory_space<vmem>>, %arg2: memref<3x32x128xbf16, #tpu.memory_space<vmem>>, %arg3: memref<1x128xf32, #tpu.memory_space<vmem>>, %arg4: memref<128x128xbf16, #tpu.memory_space<vmem>>, %arg5: memref<1x128xf32, #tpu.memory_space<vmem>>, %arg6: memref<1x8x128xf32, #tpu.memory_space<vmem>>) attributes {dimension_semantics = [#tpu.dimension_semantics<parallel>], iteration_bounds = array<i64: 2>, scalar_prefetch = 0 : i64, scratch_operands = 0 : i64, tpu.core_type = #tpu.core_type<tc>, window_params = [{transform_indices = @transform_0, window_bounds = array<i64: 1, 8, 32>}, {pipeline_mode = #tpu.pipeline_mode<synchronous>, transform_indices = @transform_1, window_bounds = array<i64: 3, 32, 128>}, {pipeline_mode = #tpu.pipeline_mode<synchronous>, transform_indices = @transform_2, window_bounds = array<i64: 1, 128>}, {pipeline_mode = #tpu.pipeline_mode<synchronous>, transform_indices = @transform_3, window_bounds = array<i64: 128, 128>}, {pipeline_mode = #tpu.pipeline_mode<synchronous>, transform_indices = @transform_4, window_bounds = array<i64: 1, 128>}, {transform_indices = @transform_5, window_bounds = array<i64: 1, 8, 128>}]} {
    %c0 = arith.constant 0 : index
    %c0_0 = arith.constant 0 : index
    %c0_1 = arith.constant 0 : index
    %0 = vector.load %arg1[%c0, %c0_0, %c0_1] : memref<1x8x32xbf16, #tpu.memory_space<vmem>>, vector<1x8x32xbf16>
    %1 = vector.shape_cast %0 : vector<1x8x32xbf16> to vector<8x32xbf16>
    %c0_2 = arith.constant 0 : index
    %c0_3 = arith.constant 0 : index
    %c0_4 = arith.constant 0 : index
    %2 = vector.load %arg2[%c0_2, %c0_3, %c0_4] : memref<3x32x128xbf16, #tpu.memory_space<vmem>>, vector<1x32x128xbf16>
    %3 = vector.shape_cast %2 : vector<1x32x128xbf16> to vector<32x128xbf16>
    %cst = arith.constant dense<0.000000e+00> : vector<8x128xf32>
    %4 = tpu.matmul %1, %3, %cst {dimension_numbers = #tpu.dot_dimension_numbers<[1], [0], [0], [1], [0, 0, 1, 1], [], []>} : vector<8x32xbf16>, vector<32x128xbf16>, vector<8x128xf32> -> vector<8x128xf32>
    %5 = vector.shape_cast %4 : vector<8x128xf32> to vector<1x8x128xf32>
    %cst_5 = arith.constant 0.000000e+00 : f32
    %6 = vector.broadcast %cst_5 : f32 to vector<1x1x128xf32>
    %7 = vector.extract_strided_slice %5 {offsets = [0, 0, 0], sizes = [1, 7, 128], strides = [1, 1, 1]} : vector<1x8x128xf32> to vector<1x7x128xf32>
    %8 = tpu.concatenate %6, %7 in 1 : vector<1x1x128xf32>, vector<1x7x128xf32> -> vector<1x8x128xf32>
    %c1 = arith.constant 1 : index
    %c0_6 = arith.constant 0 : index
    %c0_7 = arith.constant 0 : index
    %9 = vector.load %arg2[%c1, %c0_6, %c0_7] : memref<3x32x128xbf16, #tpu.memory_space<vmem>>, vector<1x32x128xbf16>
    %10 = vector.shape_cast %9 : vector<1x32x128xbf16> to vector<32x128xbf16>
    %cst_8 = arith.constant dense<0.000000e+00> : vector<8x128xf32>
    %11 = tpu.matmul %1, %10, %cst_8 {dimension_numbers = #tpu.dot_dimension_numbers<[1], [0], [0], [1], [0, 0, 1, 1], [], []>} : vector<8x32xbf16>, vector<32x128xbf16>, vector<8x128xf32> -> vector<8x128xf32>
    %12 = vector.shape_cast %11 : vector<8x128xf32> to vector<1x8x128xf32>
    %13 = arith.addf %8, %12 : vector<1x8x128xf32>
    %c2 = arith.constant 2 : index
    %c0_9 = arith.constant 0 : index
    %c0_10 = arith.constant 0 : index
    %14 = vector.load %arg2[%c2, %c0_9, %c0_10] : memref<3x32x128xbf16, #tpu.memory_space<vmem>>, vector<1x32x128xbf16>
    %15 = vector.shape_cast %14 : vector<1x32x128xbf16> to vector<32x128xbf16>
    %cst_11 = arith.constant dense<0.000000e+00> : vector<8x128xf32>
    %16 = tpu.matmul %1, %15, %cst_11 {dimension_numbers = #tpu.dot_dimension_numbers<[1], [0], [0], [1], [0, 0, 1, 1], [], []>} : vector<8x32xbf16>, vector<32x128xbf16>, vector<8x128xf32> -> vector<8x128xf32>
    %17 = vector.shape_cast %16 : vector<8x128xf32> to vector<1x8x128xf32>
    %18 = vector.extract_strided_slice %17 {offsets = [0, 1, 0], sizes = [1, 7, 128], strides = [1, 1, 1]} : vector<1x8x128xf32> to vector<1x7x128xf32>
    %cst_12 = arith.constant 0.000000e+00 : f32
    %19 = vector.broadcast %cst_12 : f32 to vector<1x1x128xf32>
    %20 = tpu.concatenate %18, %19 in 1 : vector<1x7x128xf32>, vector<1x1x128xf32> -> vector<1x8x128xf32>
    %21 = arith.addf %13, %20 : vector<1x8x128xf32>
    %22 = vector.shape_cast %21 : vector<1x8x128xf32> to vector<8x128xf32>
    %c0_13 = arith.constant 0 : index
    %c0_14 = arith.constant 0 : index
    %23 = vector.load %arg3[%c0_13, %c0_14] : memref<1x128xf32, #tpu.memory_space<vmem>>, vector<1x128xf32>
    %24 = vector.broadcast %23 : vector<1x128xf32> to vector<8x128xf32>
    %25 = arith.addf %22, %24 : vector<8x128xf32>
    %26 = arith.truncf %25 : vector<8x128xf32> to vector<8x128xbf16>
    %c0_15 = arith.constant 0 : index
    %c0_16 = arith.constant 0 : index
    %27 = vector.load %arg4[%c0_15, %c0_16] : memref<128x128xbf16, #tpu.memory_space<vmem>>, vector<128x128xbf16>
    %cst_17 = arith.constant dense<0.000000e+00> : vector<8x128xf32>
    %28 = tpu.matmul %26, %27, %cst_17 {dimension_numbers = #tpu.dot_dimension_numbers<[1], [0], [0], [1], [0, 0, 1, 1], [], []>} : vector<8x128xbf16>, vector<128x128xbf16>, vector<8x128xf32> -> vector<8x128xf32>
    %c0_18 = arith.constant 0 : index
    %c0_19 = arith.constant 0 : index
    %29 = vector.load %arg5[%c0_18, %c0_19] : memref<1x128xf32, #tpu.memory_space<vmem>>, vector<1x128xf32>
    %30 = vector.broadcast %29 : vector<1x128xf32> to vector<8x128xf32>
    %31 = arith.addf %28, %30 : vector<8x128xf32>
    %32 = vector.shape_cast %31 : vector<8x128xf32> to vector<1x8x128xf32>
    %c0_20 = arith.constant 0 : index
    %c0_21 = arith.constant 0 : index
    %c0_22 = arith.constant 0 : index
    %33 = vector.load %arg6[%c0_20, %c0_21, %c0_22] : memref<1x8x128xf32, #tpu.memory_space<vmem>>, vector<1x8x128xf32>
    tpu.vector_store %arg6[%c0_20, %c0_21, %c0_22], %32 {strides = array<i32>} : memref<1x8x128xf32, #tpu.memory_space<vmem>>, vector<1x8x128xf32>,
    return
  }
  func.func @transform_0(%arg0: i32) -> (i32, i32, i32) {
    %c0_i32 = arith.constant 0 : i32
    %c0_i32_0 = arith.constant 0 : i32
    %c0_i32_1 = arith.constant 0 : i32
    return %arg0, %c0_i32, %c0_i32_0 : i32, i32, i32
  }
  func.func @transform_1(%arg0: i32) -> (i32, i32, i32) {
    %c0_i32 = arith.constant 0 : i32
    %c0_i32_0 = arith.constant 0 : i32
    %c0_i32_1 = arith.constant 0 : i32
    %c0_i32_2 = arith.constant 0 : i32
    return %c0_i32, %c0_i32_0, %c0_i32_1 : i32, i32, i32
  }
  func.func @transform_2(%arg0: i32) -> (i32, i32) {
    %c0_i32 = arith.constant 0 : i32
    %c0_i32_0 = arith.constant 0 : i32
    %c0_i32_1 = arith.constant 0 : i32
    return %c0_i32, %c0_i32_0 : i32, i32
  }
  func.func @transform_3(%arg0: i32) -> (i32, i32) {
    %c0_i32 = arith.constant 0 : i32
    %c0_i32_0 = arith.constant 0 : i32
    %c0_i32_1 = arith.constant 0 : i32
    return %c0_i32, %c0_i32_0 : i32, i32
  }
  func.func @transform_4(%arg0: i32) -> (i32, i32) {
    %c0_i32 = arith.constant 0 : i32
    %c0_i32_0 = arith.constant 0 : i32
    %c0_i32_1 = arith.constant 0 : i32
    return %c0_i32, %c0_i32_0 : i32, i32
  }
  func.func @transform_5(%arg0: i32) -> (i32, i32, i32) {
    %c0_i32 = arith.constant 0 : i32
    %c0_i32_0 = arith.constant 0 : i32
    %c0_i32_1 = arith.constant 0 : i32
    return %arg0, %c0_i32, %c0_i32_0 : i32, i32, i32
  }
}

module attributes {stable_mosaic.version = 11 : i64} {
  func.func @_encoder_layer_kernel(%arg0: i32, %arg1: memref<1x8x32xbf16, #tpu.memory_space<vmem>>, %arg2: memref<1x1x8xf32, #tpu.memory_space<vmem>>, %arg3: memref<2x32x48xbf16, #tpu.memory_space<vmem>>, %arg4: memref<2x1x48xf32, #tpu.memory_space<vmem>>, %arg5: memref<2x16x32xbf16, #tpu.memory_space<vmem>>, %arg6: memref<1x32xf32, #tpu.memory_space<vmem>>, %arg7: memref<1x32xf32, #tpu.memory_space<vmem>>, %arg8: memref<1x32xf32, #tpu.memory_space<vmem>>, %arg9: memref<32x64xbf16, #tpu.memory_space<vmem>>, %arg10: memref<1x64xf32, #tpu.memory_space<vmem>>, %arg11: memref<64x32xbf16, #tpu.memory_space<vmem>>, %arg12: memref<1x32xf32, #tpu.memory_space<vmem>>, %arg13: memref<1x32xf32, #tpu.memory_space<vmem>>, %arg14: memref<1x32xf32, #tpu.memory_space<vmem>>, %arg15: memref<1x8x32xbf16, #tpu.memory_space<vmem>>) attributes {dimension_semantics = [#tpu.dimension_semantics<parallel>], iteration_bounds = array<i64: 2>, scalar_prefetch = 0 : i64, scratch_operands = 0 : i64, tpu.core_type = #tpu.core_type<tc>, window_params = [{transform_indices = @transform_0, window_bounds = array<i64: 1, 8, 32>}, {transform_indices = @transform_1, window_bounds = array<i64: 1, 1, 8>}, {pipeline_mode = #tpu.pipeline_mode<synchronous>, transform_indices = @transform_2, window_bounds = array<i64: 2, 32, 48>}, {pipeline_mode = #tpu.pipeline_mode<synchronous>, transform_indices = @transform_3, window_bounds = array<i64: 2, 1, 48>}, {pipeline_mode = #tpu.pipeline_mode<synchronous>, transform_indices = @transform_4, window_bounds = array<i64: 2, 16, 32>}, {pipeline_mode = #tpu.pipeline_mode<synchronous>, transform_indices = @transform_5, window_bounds = array<i64: 1, 32>}, {pipeline_mode = #tpu.pipeline_mode<synchronous>, transform_indices = @transform_6, window_bounds = array<i64: 1, 32>}, {pipeline_mode = #tpu.pipeline_mode<synchronous>, transform_indices = @transform_7, window_bounds = array<i64: 1, 32>}, {pipeline_mode = #tpu.pipeline_mode<synchronous>, transform_indices = @transform_8, window_bounds = array<i64: 32, 64>}, {pipeline_mode = #tpu.pipeline_mode<synchronous>, transform_indices = @transform_9, window_bounds = array<i64: 1, 64>}, {pipeline_mode = #tpu.pipeline_mode<synchronous>, transform_indices = @transform_10, window_bounds = array<i64: 64, 32>}, {pipeline_mode = #tpu.pipeline_mode<synchronous>, transform_indices = @transform_11, window_bounds = array<i64: 1, 32>}, {pipeline_mode = #tpu.pipeline_mode<synchronous>, transform_indices = @transform_12, window_bounds = array<i64: 1, 32>}, {pipeline_mode = #tpu.pipeline_mode<synchronous>, transform_indices = @transform_13, window_bounds = array<i64: 1, 32>}, {transform_indices = @transform_14, window_bounds = array<i64: 1, 8, 32>}]} {
    %c0 = arith.constant 0 : index
    %c0_0 = arith.constant 0 : index
    %c0_1 = arith.constant 0 : index
    %0 = vector.load %arg1[%c0, %c0_0, %c0_1] : memref<1x8x32xbf16, #tpu.memory_space<vmem>>, vector<1x8x32xbf16>
    %1 = vector.shape_cast %0 : vector<1x8x32xbf16> to vector<8x32xbf16>
    %2 = arith.extf %1 : vector<8x32xbf16> to vector<8x32xf32>
    %3 = vector.shape_cast %1 : vector<8x32xbf16> to vector<1x8x32xbf16>
    %4 = vector.shape_cast %3 : vector<1x8x32xbf16> to vector<1x8x32xbf16>
    %5 = vector.broadcast %4 : vector<1x8x32xbf16> to vector<2x8x32xbf16>
    %c0_2 = arith.constant 0 : index
    %c0_3 = arith.constant 0 : index
    %c0_4 = arith.constant 0 : index
    %6 = vector.load %arg3[%c0_2, %c0_3, %c0_4] : memref<2x32x48xbf16, #tpu.memory_space<vmem>>, vector<2x32x48xbf16>
    %cst = arith.constant dense<0.000000e+00> : vector<2x8x48xf32>
    %7 = tpu.matmul %5, %6, %cst {dimension_numbers = #tpu.dot_dimension_numbers<[2], [1], [1], [2], [0, 0, 0, 1, 1, 2], [0], [0]>} : vector<2x8x32xbf16>, vector<2x32x48xbf16>, vector<2x8x48xf32> -> vector<2x8x48xf32>
    %c0_5 = arith.constant 0 : index
    %c0_6 = arith.constant 0 : index
    %c0_7 = arith.constant 0 : index
    %8 = vector.load %arg4[%c0_5, %c0_6, %c0_7] : memref<2x1x48xf32, #tpu.memory_space<vmem>>, vector<2x1x48xf32>
    %9 = vector.broadcast %8 : vector<2x1x48xf32> to vector<2x8x48xf32>
    %10 = arith.addf %7, %9 : vector<2x8x48xf32>
    %11 = vector.extract_strided_slice %10 {offsets = [0, 0, 0], sizes = [2, 8, 16], strides = [1, 1, 1]} : vector<2x8x48xf32> to vector<2x8x16xf32>
    %12 = vector.extract_strided_slice %10 {offsets = [0, 0, 16], sizes = [2, 8, 16], strides = [1, 1, 1]} : vector<2x8x48xf32> to vector<2x8x16xf32>
    %13 = vector.extract_strided_slice %10 {offsets = [0, 0, 32], sizes = [2, 8, 16], strides = [1, 1, 1]} : vector<2x8x48xf32> to vector<2x8x16xf32>
    %c0_8 = arith.constant 0 : index
    %c0_9 = arith.constant 0 : index
    %c0_10 = arith.constant 0 : index
    %14 = vector.load %arg2[%c0_8, %c0_9, %c0_10] : memref<1x1x8xf32, #tpu.memory_space<vmem>>, vector<1x1x8xf32>
    %15 = arith.truncf %11 : vector<2x8x16xf32> to vector<2x8x16xbf16>
    %16 = arith.truncf %12 : vector<2x8x16xf32> to vector<2x8x16xbf16>
    %cst_11 = arith.constant dense<0.000000e+00> : vector<2x8x8xf32>
    %17 = tpu.matmul %15, %16, %cst_11 {dimension_numbers = #tpu.dot_dimension_numbers<[2], [2], [1], [1], [0, 0, 0, 1, 1, 1], [0], [0]>} : vector<2x8x16xbf16>, vector<2x8x16xbf16>, vector<2x8x8xf32> -> vector<2x8x8xf32>
    %18 = vector.broadcast %14 : vector<1x1x8xf32> to vector<2x8x8xf32>
    %19 = arith.addf %17, %18 : vector<2x8x8xf32>
    %cst_12 = arith.constant dense<0xFF800000> : vector<2x8xf32>
    %20 = vector.multi_reduction <maximumf>, %19, %cst_12 [2] : vector<2x8x8xf32> to vector<2x8xf32>
    %21 = vector.shape_cast %20 : vector<2x8xf32> to vector<2x8x1xf32>
    %22 = vector.broadcast %21 : vector<2x8x1xf32> to vector<2x8x8xf32>
    %23 = arith.subf %19, %22 : vector<2x8x8xf32>
    %24 = math.exp %23 : vector<2x8x8xf32>
    %cst_13 = arith.constant dense<0.000000e+00> : vector<2x8xf32>
    %25 = vector.multi_reduction <add>, %24, %cst_13 [2] : vector<2x8x8xf32> to vector<2x8xf32>
    %26 = vector.shape_cast %25 : vector<2x8xf32> to vector<2x8x1xf32>
    %27 = vector.broadcast %26 : vector<2x8x1xf32> to vector<2x8x8xf32>
    %28 = arith.divf %24, %27 : vector<2x8x8xf32>
    %29 = arith.truncf %28 : vector<2x8x8xf32> to vector<2x8x8xbf16>
    %30 = arith.truncf %13 : vector<2x8x16xf32> to vector<2x8x16xbf16>
    %cst_14 = arith.constant dense<0.000000e+00> : vector<2x8x16xf32>
    %31 = tpu.matmul %29, %30, %cst_14 {dimension_numbers = #tpu.dot_dimension_numbers<[2], [1], [1], [2], [0, 0, 0, 1, 1, 2], [0], [0]>} : vector<2x8x8xbf16>, vector<2x8x16xbf16>, vector<2x8x16xf32> -> vector<2x8x16xf32>
    %32 = arith.truncf %31 : vector<2x8x16xf32> to vector<2x8x16xbf16>
    %c0_15 = arith.constant 0 : index
    %c0_16 = arith.constant 0 : index
    %c0_17 = arith.constant 0 : index
    %33 = vector.load %arg5[%c0_15, %c0_16, %c0_17] : memref<2x16x32xbf16, #tpu.memory_space<vmem>>, vector<2x16x32xbf16>
    %cst_18 = arith.constant dense<0.000000e+00> : vector<2x8x32xf32>
    %34 = tpu.matmul %32, %33, %cst_18 {dimension_numbers = #tpu.dot_dimension_numbers<[2], [1], [1], [2], [0, 0, 0, 1, 1, 2], [0], [0]>} : vector<2x8x16xbf16>, vector<2x16x32xbf16>, vector<2x8x32xf32> -> vector<2x8x32xf32>
    %cst_19 = arith.constant dense<0.000000e+00> : vector<8x32xf32>
    %35 = vector.multi_reduction <add>, %34, %cst_19 [0] : vector<2x8x32xf32> to vector<8x32xf32>
    %c0_20 = arith.constant 0 : index
    %c0_21 = arith.constant 0 : index
    %36 = vector.load %arg6[%c0_20, %c0_21] : memref<1x32xf32, #tpu.memory_space<vmem>>, vector<1x32xf32>
    %37 = vector.broadcast %36 : vector<1x32xf32> to vector<8x32xf32>
    %38 = arith.addf %35, %37 : vector<8x32xf32>
    %39 = arith.addf %2, %38 : vector<8x32xf32>
    %c0_22 = arith.constant 0 : index
    %c0_23 = arith.constant 0 : index
    %40 = vector.load %arg7[%c0_22, %c0_23] : memref<1x32xf32, #tpu.memory_space<vmem>>, vector<1x32xf32>
    %c0_24 = arith.constant 0 : index
    %c0_25 = arith.constant 0 : index
    %41 = vector.load %arg8[%c0_24, %c0_25] : memref<1x32xf32, #tpu.memory_space<vmem>>, vector<1x32xf32>
    %cst_26 = arith.constant dense<0.000000e+00> : vector<8xf32>
    %42 = vector.multi_reduction <add>, %39, %cst_26 [1] : vector<8x32xf32> to vector<8xf32>
    %43 = vector.shape_cast %42 : vector<8xf32> to vector<8x1xf32>
    %cst_27 = arith.constant 3.200000e+01 : f32
    %44 = vector.broadcast %cst_27 : f32 to vector<8x1xf32>
    %45 = arith.divf %43, %44 : vector<8x1xf32>
    %46 = vector.broadcast %45 : vector<8x1xf32> to vector<8x32xf32>
    %47 = arith.subf %39, %46 : vector<8x32xf32>
    %48 = arith.mulf %47, %47 : vector<8x32xf32>
    %cst_28 = arith.constant dense<0.000000e+00> : vector<8xf32>
    %49 = vector.multi_reduction <add>, %48, %cst_28 [1] : vector<8x32xf32> to vector<8xf32>
    %50 = vector.shape_cast %49 : vector<8xf32> to vector<8x1xf32>
    %cst_29 = arith.constant 3.200000e+01 : f32
    %51 = vector.broadcast %cst_29 : f32 to vector<8x1xf32>
    %52 = arith.divf %50, %51 : vector<8x1xf32>
    %53 = vector.broadcast %45 : vector<8x1xf32> to vector<8x32xf32>
    %54 = arith.subf %39, %53 : vector<8x32xf32>
    %cst_30 = arith.constant 9.99999996E-13 : f32
    %55 = vector.broadcast %cst_30 : f32 to vector<8x1xf32>
    %56 = arith.addf %52, %55 : vector<8x1xf32>
    %57 = math.rsqrt %56 : vector<8x1xf32>
    %58 = vector.broadcast %57 : vector<8x1xf32> to vector<8x32xf32>
    %59 = arith.mulf %54, %58 : vector<8x32xf32>
    %60 = vector.broadcast %40 : vector<1x32xf32> to vector<8x32xf32>
    %61 = arith.mulf %59, %60 : vector<8x32xf32>
    %62 = vector.broadcast %41 : vector<1x32xf32> to vector<8x32xf32>
    %63 = arith.addf %61, %62 : vector<8x32xf32>
    %64 = arith.truncf %63 : vector<8x32xf32> to vector<8x32xbf16>
    %c0_31 = arith.constant 0 : index
    %c0_32 = arith.constant 0 : index
    %65 = vector.load %arg9[%c0_31, %c0_32] : memref<32x64xbf16, #tpu.memory_space<vmem>>, vector<32x64xbf16>
    %cst_33 = arith.constant dense<0.000000e+00> : vector<8x64xf32>
    %66 = tpu.matmul %64, %65, %cst_33 {dimension_numbers = #tpu.dot_dimension_numbers<[1], [0], [0], [1], [0, 0, 1, 1], [], []>} : vector<8x32xbf16>, vector<32x64xbf16>, vector<8x64xf32> -> vector<8x64xf32>
    %c0_34 = arith.constant 0 : index
    %c0_35 = arith.constant 0 : index
    %67 = vector.load %arg10[%c0_34, %c0_35] : memref<1x64xf32, #tpu.memory_space<vmem>>, vector<1x64xf32>
    %68 = vector.broadcast %67 : vector<1x64xf32> to vector<8x64xf32>
    %69 = arith.addf %66, %68 : vector<8x64xf32>
    %70 = arith.mulf %69, %69 : vector<8x64xf32>
    %71 = arith.mulf %69, %70 : vector<8x64xf32>
    %cst_36 = arith.constant 4.471500e-02 : f32
    %72 = vector.broadcast %cst_36 : f32 to vector<8x64xf32>
    %73 = arith.mulf %72, %71 : vector<8x64xf32>
    %74 = arith.addf %69, %73 : vector<8x64xf32>
    %cst_37 = arith.constant 0.797884583 : f32
    %75 = vector.broadcast %cst_37 : f32 to vector<8x64xf32>
    %76 = arith.mulf %75, %74 : vector<8x64xf32>
    %77 = math.tanh %76 : vector<8x64xf32>
    %cst_38 = arith.constant 1.000000e+00 : f32
    %78 = vector.broadcast %cst_38 : f32 to vector<8x64xf32>
    %79 = arith.addf %78, %77 : vector<8x64xf32>
    %cst_39 = arith.constant 5.000000e-01 : f32
    %80 = vector.broadcast %cst_39 : f32 to vector<8x64xf32>
    %81 = arith.mulf %80, %79 : vector<8x64xf32>
    %82 = arith.mulf %69, %81 : vector<8x64xf32>
    %83 = arith.truncf %82 : vector<8x64xf32> to vector<8x64xbf16>
    %c0_40 = arith.constant 0 : index
    %c0_41 = arith.constant 0 : index
    %84 = vector.load %arg11[%c0_40, %c0_41] : memref<64x32xbf16, #tpu.memory_space<vmem>>, vector<64x32xbf16>
    %cst_42 = arith.constant dense<0.000000e+00> : vector<8x32xf32>
    %85 = tpu.matmul %83, %84, %cst_42 {dimension_numbers = #tpu.dot_dimension_numbers<[1], [0], [0], [1], [0, 0, 1, 1], [], []>} : vector<8x64xbf16>, vector<64x32xbf16>, vector<8x32xf32> -> vector<8x32xf32>
    %c0_43 = arith.constant 0 : index
    %c0_44 = arith.constant 0 : index
    %86 = vector.load %arg12[%c0_43, %c0_44] : memref<1x32xf32, #tpu.memory_space<vmem>>, vector<1x32xf32>
    %87 = vector.broadcast %86 : vector<1x32xf32> to vector<8x32xf32>
    %88 = arith.addf %85, %87 : vector<8x32xf32>
    %89 = arith.addf %63, %88 : vector<8x32xf32>
    %c0_45 = arith.constant 0 : index
    %c0_46 = arith.constant 0 : index
    %90 = vector.load %arg13[%c0_45, %c0_46] : memref<1x32xf32, #tpu.memory_space<vmem>>, vector<1x32xf32>
    %c0_47 = arith.constant 0 : index
    %c0_48 = arith.constant 0 : index
    %91 = vector.load %arg14[%c0_47, %c0_48] : memref<1x32xf32, #tpu.memory_space<vmem>>, vector<1x32xf32>
    %cst_49 = arith.constant dense<0.000000e+00> : vector<8xf32>
    %92 = vector.multi_reduction <add>, %89, %cst_49 [1] : vector<8x32xf32> to vector<8xf32>
    %93 = vector.shape_cast %92 : vector<8xf32> to vector<8x1xf32>
    %cst_50 = arith.constant 3.200000e+01 : f32
    %94 = vector.broadcast %cst_50 : f32 to vector<8x1xf32>
    %95 = arith.divf %93, %94 : vector<8x1xf32>
    %96 = vector.broadcast %95 : vector<8x1xf32> to vector<8x32xf32>
    %97 = arith.subf %89, %96 : vector<8x32xf32>
    %98 = arith.mulf %97, %97 : vector<8x32xf32>
    %cst_51 = arith.constant dense<0.000000e+00> : vector<8xf32>
    %99 = vector.multi_reduction <add>, %98, %cst_51 [1] : vector<8x32xf32> to vector<8xf32>
    %100 = vector.shape_cast %99 : vector<8xf32> to vector<8x1xf32>
    %cst_52 = arith.constant 3.200000e+01 : f32
    %101 = vector.broadcast %cst_52 : f32 to vector<8x1xf32>
    %102 = arith.divf %100, %101 : vector<8x1xf32>
    %103 = vector.broadcast %95 : vector<8x1xf32> to vector<8x32xf32>
    %104 = arith.subf %89, %103 : vector<8x32xf32>
    %cst_53 = arith.constant 9.99999996E-13 : f32
    %105 = vector.broadcast %cst_53 : f32 to vector<8x1xf32>
    %106 = arith.addf %102, %105 : vector<8x1xf32>
    %107 = math.rsqrt %106 : vector<8x1xf32>
    %108 = vector.broadcast %107 : vector<8x1xf32> to vector<8x32xf32>
    %109 = arith.mulf %104, %108 : vector<8x32xf32>
    %110 = vector.broadcast %90 : vector<1x32xf32> to vector<8x32xf32>
    %111 = arith.mulf %109, %110 : vector<8x32xf32>
    %112 = vector.broadcast %91 : vector<1x32xf32> to vector<8x32xf32>
    %113 = arith.addf %111, %112 : vector<8x32xf32>
    %114 = arith.truncf %113 : vector<8x32xf32> to vector<8x32xbf16>
    %115 = vector.shape_cast %114 : vector<8x32xbf16> to vector<1x8x32xbf16>
    %c0_54 = arith.constant 0 : index
    %c0_55 = arith.constant 0 : index
    %c0_56 = arith.constant 0 : index
    %116 = vector.load %arg15[%c0_54, %c0_55, %c0_56] : memref<1x8x32xbf16, #tpu.memory_space<vmem>>, vector<1x8x32xbf16>
    tpu.vector_store %arg15[%c0_54, %c0_55, %c0_56], %115 {strides = array<i32>} : memref<1x8x32xbf16, #tpu.memory_space<vmem>>, vector<1x8x32xbf16>,
    return
  }
  func.func @transform_0(%arg0: i32) -> (i32, i32, i32) {
    %c0_i32 = arith.constant 0 : i32
    %c0_i32_0 = arith.constant 0 : i32
    %c0_i32_1 = arith.constant 0 : i32
    return %arg0, %c0_i32, %c0_i32_0 : i32, i32, i32
  }
  func.func @transform_1(%arg0: i32) -> (i32, i32, i32) {
    %c0_i32 = arith.constant 0 : i32
    %c0_i32_0 = arith.constant 0 : i32
    %c0_i32_1 = arith.constant 0 : i32
    return %arg0, %c0_i32, %c0_i32_0 : i32, i32, i32
  }
  func.func @transform_2(%arg0: i32) -> (i32, i32, i32) {
    %c0_i32 = arith.constant 0 : i32
    %c0_i32_0 = arith.constant 0 : i32
    %c0_i32_1 = arith.constant 0 : i32
    %c0_i32_2 = arith.constant 0 : i32
    return %c0_i32, %c0_i32_0, %c0_i32_1 : i32, i32, i32
  }
  func.func @transform_3(%arg0: i32) -> (i32, i32, i32) {
    %c0_i32 = arith.constant 0 : i32
    %c0_i32_0 = arith.constant 0 : i32
    %c0_i32_1 = arith.constant 0 : i32
    %c0_i32_2 = arith.constant 0 : i32
    return %c0_i32, %c0_i32_0, %c0_i32_1 : i32, i32, i32
  }
  func.func @transform_4(%arg0: i32) -> (i32, i32, i32) {
    %c0_i32 = arith.constant 0 : i32
    %c0_i32_0 = arith.constant 0 : i32
    %c0_i32_1 = arith.constant 0 : i32
    %c0_i32_2 = arith.constant 0 : i32
    return %c0_i32, %c0_i32_0, %c0_i32_1 : i32, i32, i32
  }
  func.func @transform_5(%arg0: i32) -> (i32, i32) {
    %c0_i32 = arith.constant 0 : i32
    %c0_i32_0 = arith.constant 0 : i32
    %c0_i32_1 = arith.constant 0 : i32
    return %c0_i32, %c0_i32_0 : i32, i32
  }
  func.func @transform_6(%arg0: i32) -> (i32, i32) {
    %c0_i32 = arith.constant 0 : i32
    %c0_i32_0 = arith.constant 0 : i32
    %c0_i32_1 = arith.constant 0 : i32
    return %c0_i32, %c0_i32_0 : i32, i32
  }
  func.func @transform_7(%arg0: i32) -> (i32, i32) {
    %c0_i32 = arith.constant 0 : i32
    %c0_i32_0 = arith.constant 0 : i32
    %c0_i32_1 = arith.constant 0 : i32
    return %c0_i32, %c0_i32_0 : i32, i32
  }
  func.func @transform_8(%arg0: i32) -> (i32, i32) {
    %c0_i32 = arith.constant 0 : i32
    %c0_i32_0 = arith.constant 0 : i32
    %c0_i32_1 = arith.constant 0 : i32
    return %c0_i32, %c0_i32_0 : i32, i32
  }
  func.func @transform_9(%arg0: i32) -> (i32, i32) {
    %c0_i32 = arith.constant 0 : i32
    %c0_i32_0 = arith.constant 0 : i32
    %c0_i32_1 = arith.constant 0 : i32
    return %c0_i32, %c0_i32_0 : i32, i32
  }
  func.func @transform_10(%arg0: i32) -> (i32, i32) {
    %c0_i32 = arith.constant 0 : i32
    %c0_i32_0 = arith.constant 0 : i32
    %c0_i32_1 = arith.constant 0 : i32
    return %c0_i32, %c0_i32_0 : i32, i32
  }
  func.func @transform_11(%arg0: i32) -> (i32, i32) {
    %c0_i32 = arith.constant 0 : i32
    %c0_i32_0 = arith.constant 0 : i32
    %c0_i32_1 = arith.constant 0 : i32
    return %c0_i32, %c0_i32_0 : i32, i32
  }
  func.func @transform_12(%arg0: i32) -> (i32, i32) {
    %c0_i32 = arith.constant 0 : i32
    %c0_i32_0 = arith.constant 0 : i32
    %c0_i32_1 = arith.constant 0 : i32
    return %c0_i32, %c0_i32_0 : i32, i32
  }
  func.func @transform_13(%arg0: i32) -> (i32, i32) {
    %c0_i32 = arith.constant 0 : i32
    %c0_i32_0 = arith.constant 0 : i32
    %c0_i32_1 = arith.constant 0 : i32
    return %c0_i32, %c0_i32_0 : i32, i32
  }
  func.func @transform_14(%arg0: i32) -> (i32, i32, i32) {
    %c0_i32 = arith.constant 0 : i32
    %c0_i32_0 = arith.constant 0 : i32
    %c0_i32_1 = arith.constant 0 : i32
    return %arg0, %c0_i32, %c0_i32_0 : i32, i32, i32
  }
}

</mosaic_0001>

<bundles_post_ra>
// kernel: _lambda_.5
= control target key start
LH: loop header
LB: loop body
LE: loop exit
PB: predicated region body
PF: predicated region fallthrough
CT: control target
= control target key end

     0   :  { %s744_s18 = smov 0   ;;  %s820_s0 = inlined_call_operand.vmem [shape: bf16[2,8,32], index: 0, kind: input, shape index: {}]   ;;  %s821_s1 = inlined_call_operand.vmem [shape: bf16[3,32,128], index: 1, kind: input, shape index: {}]   ;;  %s822_s2 = inlined_call_operand.vmem [shape: f32[1,128], index: 2, kind: input, shape index: {}]   ;;  %s823_s3 = inlined_call_operand.vmem [shape: bf16[128,128], index: 3, kind: input, shape index: {}]   ;;  %s824_s4 = inlined_call_operand.vmem [shape: f32[1,128], index: 4, kind: input, shape index: {}]   ;;  %s825_s5 = inlined_call_operand.vmem [shape: f32[2,8,128], index: 5, kind: output, shape index: {}]  }
   0x1 LB: > { %s582_s19 = sadd.s32 4294967295, %s710_s18   ;;  %p586_p0 = scmp.ge.s32.totalorder %s710_s18, 1  ;;  %s710_s18 = sphi %s744_s18, %s15_s18  }
   0x2   : > { %p186_p1 = scmp.lt.s32.totalorder %s710_s18, 3 }
   0x4   : > { %p187_p2 = pnand %p586_p0, %p186_p1 }
   0x5   : > { %v690_v0 = vld [vmem:[%s821_s1] sm:$0xff] (!%p187_p2)   ;;  %v712_v1 = vmov (!%p187_p2), 0.0   ;;  %v691_v2 = vld [vmem:[%s821_s1 + $0x8] sm:$0xff] (!%p187_p2)   ;;  %vm713_vm0 = vmmov (!%p187_p2), 0   ;;  %p212_p3 = scmp.lt.s32.totalorder (!%p187_p2), %s582_s19, 1  ;;  %vm238_vm1 = vcmask (!%p187_p2), 261120  }
   0x6   : > { %190 = sbr.rel (%p187_p2) target bundleno = 469 (0x1d5), region = 40  ;;  %636 = vmatprep.subr.bf16.mxu0 (!%p187_p2), %v712_v1  ;;  %660 = vmatprep.subr.bf16.mxu1 (!%p187_p2), %v712_v1  ;;  %v692_v3 = vld [vmem:[%s821_s1 + $0x10] sm:$0xff] (!%p187_p2)   ;;  %v696_v4 = vld [vmem:[%s823_s3] sm:$0xff] (!%p187_p2)   ;;  %v693_v6 = vld [vmem:[%s821_s1 + $0x18] sm:$0xff] (!%p187_p2)   ;;  %vm285_vm2 = vcmask (!%p187_p2), 1040384   ;;  %vm405_vm3 = vcmask (!%p187_p2), 1046528  }
   0x7   : > { %637 = vmatpush3.bf16.msra.mxu0 (!%p187_p2), %v690_v0  ;;  %640 = vmatprep.mubr.msk.bf16.mxu0 (!%p187_p2), %vm713_vm0, %v712_v1  ;;  %v697_v7 = vld [vmem:[%s823_s3 + $0x8] sm:$0xff] (!%p187_p2)   ;;  %v694_v8 = vld [vmem:[%s821_s1 + $0x20] sm:$0xff] (!%p187_p2)   ;;  %v698_v10 = vld [vmem:[%s823_s3 + $0x10] sm:$0xff] (!%p187_p2)  }
   0x8   : > { %638 = vmatprep.subr.bf16.mxu0 (!%p187_p2), %v712_v1  ;;  %676 = vmatprep.mubr.msk.bf16.mxu1 (!%p187_p2), %vm713_vm0, %v712_v1  ;;  %v695_v9 = vld [vmem:[%s821_s1 + $0x28] sm:$0xff] (!%p187_p2)   ;;  %v699_v11 = vld [vmem:[%s823_s3 + $0x18] sm:$0xff] (!%p187_p2)   ;;  %v700_v12 = vld [vmem:[%s823_s3 + $0x20] sm:$0xff] (!%p187_p2)  }
   0x9   : > { %661 = vmatpush3.bf16.msra.mxu1 (!%p187_p2), %v696_v4  ;;  %v701_v13 = vld [vmem:[%s823_s3 + $0x28] sm:$0xff] (!%p187_p2)   ;;  %v702_v14 = vld [vmem:[%s823_s3 + $0x30] sm:$0xff] (!%p187_p2)   ;;  %v703_v15 = vld [vmem:[%s823_s3 + $0x38] sm:$0xff] (!%p187_p2)  }
   0xa   : > { %662 = vmatprep.subr.bf16.mxu1 (!%p187_p2), %v712_v1  ;;  %v606_v33 = vld [vmem:[%s822_s2] ss:$0 sm:$0xff] (!%p187_p2) }
   0xb   : > { %639 = vmatpush3.bf16.msra.mxu0 (!%p187_p2), %v691_v2  ;;  %v607_v37 = vld [vmem:[%s824_s4] ss:$0 sm:$0xff] (!%p187_p2) }
   0xc   : > { %644 = vmatprep.subr.bf16.mxu0 (!%p187_p2), %v712_v1 }
   0xd   : > { %s827_s19 = smov (!%p212_p3, %s582_s19), 1  ;;  %663 = vmatpush3.bf16.msra.mxu1 %v697_v7 }
   0xe   : > { %s587_s24 = sshll.u32 %s827_s19, 2  ;;  %664 = vmatprep.subr.bf16.mxu1 %v712_v1  ;;  %s588_s6 = sshll.u32 %s827_s19, 3 }
   0xf   : > { %s215_s29 = scalar_lea.vmem %s820_s0, %s587_s24  ;;  %s219_s11 = scalar_lea.vmem %s825_s5, %s588_s6 }
  0x10   : > { %v221_v5 = vld [vmem:[%s215_s29] sm:$0xf] }
  0x11   : > { %641 = vmatmul.mubr.msk.bf16.vlgmr.msra.gmra.mrb[0].mxu0 %vm238_vm1, %v221_v5  ;;  %665 = vmatpush3.bf16.msra.mxu1 %v698_v10 }
  0x12   : > { %645 = vmatpush3.bf16.msra.mxu0 %v692_v3  ;;  %648 = vmatprep.mubr.msk.bf16.mxu0 %vm713_vm0, %v712_v1 }
  0x13   : > { %646 = vmatprep.subr.bf16.mxu0 %v712_v1  ;;  %666 = vmatprep.subr.bf16.mxu1 %v712_v1 }
  0x15   : > { %667 = vmatpush3.bf16.msra.mxu1 %v699_v11 }
  0x16   : > { %647 = vmatpush3.bf16.msra.mxu0 %v693_v6  ;;  %668 = vmatprep.subr.bf16.mxu1 %v712_v1 }
  0x17   : > { %652 = vmatprep.subr.bf16.mxu0 %v712_v1 }
  0x19   : > { %649 = vmatmul.mubr.msk.bf16.vlgmr.msra.gmra.mrb[4].mxu0 %vm238_vm1, %v221_v5  ;;  %669 = vmatpush3.bf16.msra.mxu1 %v700_v12 }
  0x1a   : > { %653 = vmatpush3.bf16.msra.mxu0 %v694_v8  ;;  %656 = vmatprep.mubr.msk.bf16.mxu0 %vm713_vm0, %v712_v1 }
  0x1b   : > { %654 = vmatprep.subr.bf16.mxu0 %v712_v1  ;;  %670 = vmatprep.subr.bf16.mxu1 %v712_v1 }
  0x1d   : > { %671 = vmatpush3.bf16.msra.mxu1 %v701_v13 }
  0x1e   : > { %655 = vmatpush3.bf16.msra.mxu0 %v695_v9  ;;  %672 = vmatprep.subr.bf16.mxu1 %v712_v1 }
  0x21   : > { %657 = vmatmul.mubr.msk.bf16.vlgmr.msra.gmra.mrb[8].mxu0 %vm238_vm1, %v221_v5  ;;  %673 = vmatpush3.bf16.msra.mxu1 %v702_v14 }
  0x22   : > { %674 = vmatprep.subr.bf16.mxu1 %v712_v1 }
  0x25   : > { %675 = vmatpush3.bf16.msra.mxu1 %v703_v15 }
  0xe4   : > { %v276_v16 = vpop.f32.mrb[0].mxu0 }
  0xe5   : > { %v642_v17 = vpop.f32.mrb[1].mxu0  ;;  %v283_v20 = vrot.slane %v276_v16, 7 }
  0xe6   : > { %v279_v18 = vpop.f32.mrb[2].mxu0 }
  0xe7   : > { %v643_v19 = vpop.f32.mrb[3].mxu0  ;;  %v286_v21 = vsel %vm285_vm2, 0.0, %v283_v20 }
  0xec   : > { %v338_v22 = vpop.f32.mrb[4].mxu0 }
  0xed   : > { %v344_v23 = vadd.f32 %v338_v22, %v286_v21  ;;  %v650_v24 = vpop.f32.mrb[5].mxu0 }
  0xee   : > { %v341_v25 = vpop.f32.mrb[6].mxu0 }
  0xef   : > { %v651_v26 = vpop.f32.mrb[7].mxu0 }
  0xf4   : > { %v396_v27 = vpop.f32.mrb[8].mxu0 }
  0xf5   : > { %v403_v28 = vrot.slane %v396_v27, 1  ;;  %v658_v29 = vpop.f32.mrb[9].mxu0 }
  0xf6   : > { %v399_v30 = vpop.f32.mrb[10].mxu0 }
  0xf7   : > { %v406_v31 = vsel %vm405_vm3, %v403_v28, 0.0  ;;  %v659_v32 = vpop.f32.mrb[11].mxu0 }
  0xf8   : > { %v407_v34 = vadd.f32 %v406_v31, %v344_v23 }
  0xfa   : > { %v415_v35 = vadd.f32 %v606_v33, %v407_v34 }
  0xfc   : > { %v416_v36 = vpack.c.bf16 %v415_v35, %v415_v35 }
  0xfe   : > { %677 = vmatmul.mubr.bf16.vlgmr.msra.gmra.mrb[0].mxu1 %v416_v36 }
 0x1d1   : > { %v522_v38 = vpop.f32.mrb[0].mxu1 }
 0x1d2   : > { %v523_v39 = vadd.f32 %v607_v37, %v522_v38  ;;  %v678_v40 = vpop.f32.mrb[1].mxu1 }
 0x1d3   : > { %v525_v41 = vpop.f32.mrb[2].mxu1 }
 0x1d4   : > { %528 = vst [vmem:[%s219_s11] sm:$0xff] %v523_v39  ;;  %v679_v42 = vpop.f32.mrb[3].mxu1 }
 0x1d5 PF: > { %s15_s18 = sadd.s32 1, %s710_s18  }
 0x1d6   : > { %p12_p4 = scmp.ge.s32.totalorder %s15_s18, 4  }
 0x1d8   :  { %14 = sbr.rel (!%p12_p4) target bundleno = 1 (0x1), region = 72 }

// kernel: _lambda_.3
= control target key start
LH: loop header
LB: loop body
LE: loop exit
PB: predicated region body
PF: predicated region fallthrough
CT: control target
= control target key end

     0   :  { %s1505_s29 = smov 0   ;;  %s1660_s0 = inlined_call_operand.vmem [shape: bf16[2,8,32], index: 0, kind: input, shape index: {}]   ;;  %s1661_s1 = inlined_call_operand.vmem [shape: f32[2,1,8], index: 1, kind: input, shape index: {}]   ;;  %s1662_s2 = inlined_call_operand.vmem [shape: bf16[2,32,48], index: 2, kind: input, shape index: {}]   ;;  %s1663_s3 = inlined_call_operand.vmem [shape: f32[2,1,48], index: 3, kind: input, shape index: {}]   ;;  %s1664_s4 = inlined_call_operand.vmem [shape: bf16[2,16,32], index: 4, kind: input, shape index: {}]   ;;  %s1665_s5 = inlined_call_operand.vmem [shape: f32[1,32], index: 5, kind: input, shape index: {}, may-alias: {5,7,11,13}]   ;;  %s1666_s6 = inlined_call_operand.vmem [shape: f32[1,32], index: 6, kind: input, shape index: {}, may-alias: {6,12}]   ;;  %s1667_s7 = inlined_call_operand.vmem [shape: f32[1,32], index: 7, kind: input, shape index: {}, may-alias: {5,7,11,13}]   ;;  %s1668_s8 = inlined_call_operand.vmem [shape: bf16[32,64], index: 8, kind: input, shape index: {}]   ;;  %s1669_s9 = inlined_call_operand.vmem [shape: f32[1,64], index: 9, kind: input, shape index: {}]   ;;  %s1670_s10 = inlined_call_operand.vmem [shape: bf16[64,32], index: 10, kind: input, shape index: {}]   ;;  %s1671_s11 = inlined_call_operand.vmem [shape: f32[1,32], index: 11, kind: input, shape index: {}, may-alias: {5,7,11,13}]   ;;  %s1672_s12 = inlined_call_operand.vmem [shape: f32[1,32], index: 12, kind: input, shape index: {}, may-alias: {6,12}]   ;;  %s1673_s13 = inlined_call_operand.vmem [shape: f32[1,32], index: 13, kind: input, shape index: {}, may-alias: {5,7,11,13}]   ;;  %s1674_s14 = inlined_call_operand.vmem [shape: bf16[2,8,32], index: 14, kind: output, shape index: {}]  }
   0x1 LB: > { %s1241_s30 = sadd.s32 4294967295, %s1424_s29   ;;  %p1245_p0 = scmp.ge.s32.totalorder %s1424_s29, 1  ;;  %s1424_s29 = sphi %s1505_s29, %s24_s29  }
   0x2   : > { %p419_p1 = scmp.lt.s32.totalorder %s1424_s29, 3 }
   0x4   : > { %p420_p2 = pnand %p1245_p0, %p419_p1 }
   0x5   : > { %v1392_v0 = vld [vmem:[%s1662_s2] sm:$0xff] (!%p420_p2)   ;;  %v1426_v1 = vmov (!%p420_p2), 0.0   ;;  %v1393_v2 = vld [vmem:[%s1662_s2 + $0x10] sm:$0xff] (!%p420_p2)   ;;  %v1394_v3 = vld [vmem:[%s1662_s2 + $0x8] sm:$0xff] (!%p420_p2)   ;;  %vm1427_vm0 = vmmov (!%p420_p2), 0   ;;  %p466_p3 = scmp.lt.s32.totalorder (!%p420_p2), %s1241_s30, 1 }
   0x6   : > { %423 = sbr.rel (%p420_p2) target bundleno = 2413 (0x96d), region = 76  ;;  %1308 = vmatprep.subr.bf16.mxu0 (!%p420_p2), %v1426_v1  ;;  %1316 = vmatprep.subr.bf16.mxu1 (!%p420_p2), %v1426_v1  ;;  %v1395_v4 = vld [vmem:[%s1662_s2 + $0x18] sm:$0xff] (!%p420_p2)   ;;  %vm514_vm1 = vcmask (!%p420_p2), 261120   ;;  %v1248_v6 = vld [vmem:[%s1663_s3] ss:$0 sm:$0xff] (!%p420_p2)  ;;  %s1428_s17 = smov (!%p420_p2), 112  }
   0x7   : > { %1309 = vmatpush3.bf16.msra.mxu0 (!%p420_p2), %v1392_v0  ;;  %1312 = vmatprep.mubr.msk.bf16.mxu0 (!%p420_p2), %vm1427_vm0, %v1426_v1  ;;  %v1249_v7 = vld [vmem:[%s1663_s3 + $0x1] ss:$0 sm:$0xff] (!%p420_p2)  ;;  %vm622_vm2 = vcmask (!%p420_p2), 130048   ;;  %vm718_vm3 = vcmask (!%p420_p2), 64512   ;;  %s1429_s21 = smov (!%p420_p2), 96   ;;  %vm748_vm4 = vcmask (!%p420_p2), 1043456  }
   0x8   : > { %1317 = vmatpush3.bf16.msra.mxu1 (!%p420_p2), %v1393_v2  ;;  %1310 = vmatprep.subr.bf16.mxu0 (!%p420_p2), %v1426_v1  ;;  %v1396_v59 = vld [vmem:[%s1664_s4] sm:$0xff] (!%p420_p2)   ;;  %v1397_v60 = vld [vmem:[%s1664_s4 + $0x8] sm:$0xff] (!%p420_p2)   ;;  %vm1102_vm5 = vcmask (!%p420_p2), 523264   ;;  %vm1177_vm6 = vcmask (!%p420_p2), 257024  }
   0x9   : > { %1318 = vmatprep.subr.bf16.mxu1 (!%p420_p2), %v1426_v1  ;;  %1320 = vmatprep.mubr.msk.bf16.mxu1 (!%p420_p2), %vm1427_vm0, %v1426_v1 }
   0xb   : > { %1311 = vmatpush3.bf16.msra.mxu0 (!%p420_p2), %v1394_v3 }
   0xc   : > { %1319 = vmatpush3.bf16.msra.mxu1 (!%p420_p2), %v1395_v4  ;;  %1324 = vmatprep.subr.bf16.mxu0 (!%p420_p2), %v1426_v1 }
   0xd   : > { %s1676_s30 = smov (!%p466_p3, %s1241_s30), 1  ;;  %1330 = vmatprep.subr.bf16.mxu1 %v1426_v1 }
   0xe   : > { %s1246_s23 = sshll.u32 %s1676_s30, 2  ;;  %s472_s20 = scalar_lea.vmem %s1661_s1, %s1676_s30 }
   0xf   : > { %s469_s26 = scalar_lea.vmem %s1660_s0, %s1246_s23  ;;  %v1256_v24 = vld [vmem:[%s472_s20] ss:$0 sm:$0xff]  ;;  %s476_s15 = scalar_lea.vmem %s1674_s14, %s1246_s23 }
  0x10   : > { %v1542_v5 = vld [vmem:[%s469_s26] sm:$0xf] }
  0x11   : > { %1313 = vmatmul.mubr.msk.bf16.vlgmr.msra.gmra.mrb[0].mxu0 %vm514_vm1, %v1542_v5  ;;  %1321 = vmatmul.mubr.msk.bf16.vlgmr.msra.gmra.mrb[0].mxu1 %vm514_vm1, %v1542_v5 }
  0x12   : > { %1326 = vmatprep.mubr.msk.bf16.mxu0 %vm1427_vm0, %v1426_v1  ;;  %1332 = vmatprep.mubr.msk.bf16.mxu1 %vm1427_vm0, %v1426_v1 }
  0xe4   : > { %v552_v8 = vpop.f32.mrb[0].mxu0  ;;  %v604_v11 = vpop.f32.mrb[0].mxu1 }
  0xe5   : > { %v553_v9 = vadd.f32 %v1248_v6, %v552_v8  ;;  %v1314_v10 = vpop.f32.mrb[1].mxu0  ;;  %v605_v12 = vadd.f32 %v1249_v7, %v604_v11  ;;  %v1322_v14 = vpop.f32.mrb[1].mxu1 }
  0xe6   : > { %v555_v13 = vpop.f32.mrb[2].mxu0  ;;  %v607_v17 = vpop.f32.mrb[2].mxu1 }
  0xe7   : > { %v611_v15 = vpack.c.bf16 %v553_v9, %v553_v9  ;;  %v1315_v16 = vpop.f32.mrb[3].mxu0  ;;  %v1323_v18 = vpop.f32.mrb[3].mxu1  ;;  %v612_v19 = vpack.c.bf16 %v605_v12, %v605_v12 }
  0xe8   : > { %v1265_v16 = vld [vmem:[%s1665_s5] ss:$0 sm:$0xff] }
  0xe9   : > { %620 = vrot.lane.b32.xlu0 %v611_v15, %s1428_s17 }
  0xed   : > { %670 = vrot.lane.b32.xlu0 %v612_v19, %s1428_s17 }
 0x15b   : > { %v621_v20 = vpop.permute.xlu0 %620 }
 0x15c   : > { %v627_v21 = vsel %vm622_vm2, %v621_v20, 0  ;;  %v479_v20 = vunpack.c.l.bf16 %v1542_v5  ;;  %v1399_v5 = vld [vmem:[%s1668_s8 + $0x8] sm:$0xff]  }
 0x15d   : > { %1325 = vmatpush3.bf16.xpose.msra.mxu0 %v627_v21 }
 0x15e   : > { %1336 = vmatprep.subr.bf16.mxu0 %v1426_v1 }
 0x15f   : > { %v671_v22 = vpop.permute.xlu0 %670 }
 0x160   : > { %v676_v23 = vsel %vm622_vm2, %v671_v22, 0 }
 0x161   : > { %1331 = vmatpush3.bf16.xpose.msra.mxu1 %v676_v23 }
 0x162   : > { %1342 = vmatprep.subr.bf16.mxu1 %v1426_v1 }
 0x164   : > { %1327 = vmatmul.mubr.msk.bf16.vlgmr.msra.gmra.mrb[4].mxu0 %vm622_vm2, %v611_v15 }
 0x165   : > { %1338 = vmatprep.mubr.msk.bf16.mxu0 %vm1427_vm0, %v1426_v1 }
 0x168   : > { %1333 = vmatmul.mubr.msk.bf16.vlgmr.msra.gmra.mrb[4].mxu1 %vm622_vm2, %v612_v19 }
 0x169   : > { %1344 = vmatprep.mubr.msk.bf16.mxu1 %vm1427_vm0, %v1426_v1 }
 0x237   : > { %v663_v25 = vpop.f32.mrb[4].mxu0 }
 0x238   : > { %v664_v26 = vadd.f32 %v1256_v24, %v663_v25  ;;  %v1328_v27 = vpop.f32.mrb[5].mxu0 }
 0x239   : > { %v666_v28 = vpop.f32.mrb[6].mxu0 }
 0x23a   : > { %v1329_v29 = vpop.f32.mrb[7].mxu0  ;;  %v719_v30 = vsel %vm718_vm3, %v664_v26, -inf }
 0x23b   : > { %v712_v31 = vpop.f32.mrb[4].mxu1  ;;  %720 = vmax.xlane.f32.xlu1 %v719_v30  ;;  %v1398_v30 = vld [vmem:[%s1668_s8] sm:$0xff]  }
 0x23c   : > { %v713_v32 = vadd.f32 %v1256_v24, %v712_v31  ;;  %v1334_v33 = vpop.f32.mrb[5].mxu1 }
 0x23d   : > { %v715_v34 = vpop.f32.mrb[6].mxu1 }
 0x23e   : > { %v1335_v35 = vpop.f32.mrb[7].mxu1  ;;  %v722_v36 = vsel %vm718_vm3, %v713_v32, -inf }
 0x23f   : > { %723 = vmax.xlane.f32.xlu1 %v722_v36  ;;  %v1266_v35 = vld [vmem:[%s1666_s6] ss:$0 sm:$0xff] }
 0x250   : > { %743 = vrot.lane.b32.xlu1 %v611_v15, %s1429_s21 }
 0x2c8   : > { %v721_v37 = vpop.xlane.xlu1 %720 }
 0x2c9   : > { %v725_v38 = vsub.f32 %v664_v26, %v721_v37  ;;  %v1267_v37 = vld [vmem:[%s1667_s7] ss:$0 sm:$0xff] }
 0x2cb   : > { %v727_v39 = vmul.f32 1.442695, %v725_v38 }
 0x2cc   : > { %v724_v40 = vpop.xlane.xlu1 %723 }
 0x2cd   : > { %1404 = vpow2.f32 %v727_v39  ;;  %v726_v41 = vsub.f32 %v713_v32, %v724_v40 }
 0x2cf   : > { %v729_v42 = vmul.f32 1.442695, %v726_v41  ;;  %v1400_v41 = vld [vmem:[%s1670_s10] sm:$0xff]  }
 0x2d0   : > { %v744_v43 = vpop.permute.xlu1 %743 }
 0x2d1   : > { %1406 = vpow2.f32 %v729_v42  ;;  %v750_v44 = vsel %vm748_vm4, %v744_v43, 0  ;;  %v1401_v42 = vld [vmem:[%s1670_s10 + $0x8] sm:$0xff]   ;;  %v1402_v43 = vld [vmem:[%s1670_s10 + $0x10] sm:$0xff]  }
 0x2d2   : > { %1337 = vmatpush3.bf16.msra.mxu0 %v750_v44  ;;  %v1403_v44 = vld [vmem:[%s1670_s10 + $0x18] sm:$0xff]  }
 0x2d3   : > { %1348 = vmatprep.subr.bf16.mxu0 %v1426_v1 }
 0x2d7   : > { %v1405_v45 = vpop.eup %1404 }
 0x2d8   : > { %v731_v46 = vsel %vm718_vm3, %v1405_v45, 0.0 }
 0x2d9   : > { %732 = vadd.xlane.f32.xlu0 %v731_v46 }
 0x2db   : > { %v1407_v47 = vpop.eup %1406 }
 0x2dc   : > { %v734_v48 = vsel %vm718_vm3, %v1407_v47, 0.0 }
 0x2dd   : > { %735 = vadd.xlane.f32.xlu1 %v734_v48 }
 0x2ee   : > { %792 = vrot.lane.b32.xlu1 %v612_v19, %s1429_s21 }
 0x366   : > { %v733_v49 = vpop.xlane.xlu0 %732 }
 0x367   : > { %1408 = vrcp.f32 %v733_v49 }
 0x36a   : > { %v736_v50 = vpop.xlane.xlu1 %735 }
 0x36b   : > { %1410 = vrcp.f32 %v736_v50 }
 0x36e   : > { %v793_v51 = vpop.permute.xlu1 %792 }
 0x36f   : > { %v798_v52 = vsel %vm748_vm4, %v793_v51, 0 }
 0x370   : > { %1343 = vmatpush3.bf16.msra.mxu1 %v798_v52 }
 0x371   : > { %v1409_v53 = vpop.eup %1408  ;;  %1354 = vmatprep.subr.bf16.mxu1 %v1426_v1 }
 0x372   : > { %v738_v54 = vmul.f32 %v1409_v53, %v1405_v45  ;;  %v1268_v45 = vld [vmem:[%s1669_s9] ss:$0 sm:$0xff] }
 0x374   : > { %v741_v55 = vpack.c.bf16 %v738_v54, %v738_v54 }
 0x375   : > { %v1411_v56 = vpop.eup %1410 }
 0x376   : > { %v740_v57 = vmul.f32 %v1411_v56, %v1407_v47  ;;  %1339 = vmatmul.mubr.msk.bf16.vlgmr.msra.gmra.mrb[8].mxu0 %vm718_vm3, %v741_v55 }
 0x377   : > { %1350 = vmatprep.mubr.msk.bf16.mxu0 %vm1427_vm0, %v1426_v1  ;;  %1349 = vmatpush3.bf16.msra.mxu0 %v1396_v59 }
 0x378   : > { %v742_v58 = vpack.c.bf16 %v740_v57, %v740_v57  ;;  %1360 = vmatprep.subr.bf16.mxu0 %v1426_v1 }
 0x37a   : > { %1345 = vmatmul.mubr.msk.bf16.vlgmr.msra.gmra.mrb[8].mxu1 %vm718_vm3, %v742_v58 }
 0x37b   : > { %1356 = vmatprep.mubr.msk.bf16.mxu1 %vm1427_vm0, %v1426_v1  ;;  %1355 = vmatpush3.bf16.msra.mxu1 %v1397_v60  ;;  %v1272_v60 = vld [vmem:[%s1671_s11] ss:$0 sm:$0xff] }
 0x37c   : > { %1368 = vmatprep.subr.bf16.mxu1 %v1426_v1 }
 0x449   : > { %v786_v61 = vpop.f32.mrb[8].mxu0 }
 0x44a   : > { %v840_v62 = vpack.c.bf16 %v786_v61, %v786_v61  ;;  %v1340_v63 = vpop.f32.mrb[9].mxu0 }
 0x44b   : > { %v789_v0 = vpop.f32.mrb[10].mxu0 }
 0x44c   : > { %v1341_v2 = vpop.f32.mrb[11].mxu0  ;;  %1351 = vmatmul.mubr.msk.bf16.vlgmr.msra.gmra.mrb[12].mxu0 %vm622_vm2, %v840_v62 }
 0x44d   : > { %v834_v3 = vpop.f32.mrb[8].mxu1  ;;  %1364 = vmatprep.mubr.msk.bf16.mxu0 %vm1427_vm0, %v1426_v1  ;;  %1361 = vmatpush3.bf16.msra.mxu0 %v1398_v30 }
 0x44e   : > { %v841_v4 = vpack.c.bf16 %v834_v3, %v834_v3  ;;  %v1346_v6 = vpop.f32.mrb[9].mxu1  ;;  %1362 = vmatprep.subr.bf16.mxu0 %v1426_v1 }
 0x44f   : > { %v837_v7 = vpop.f32.mrb[10].mxu1 }
 0x450   : > { %v1347_v8 = vpop.f32.mrb[11].mxu1  ;;  %1357 = vmatmul.mubr.msk.bf16.vlgmr.msra.gmra.mrb[12].mxu1 %vm622_vm2, %v841_v4 }
 0x451   : > { %1376 = vmatprep.mubr.msk.bf16.mxu1 %vm1427_vm0, %v1426_v1  ;;  %1363 = vmatpush3.bf16.msra.mxu0 %v1399_v5 }
 0x452   : > { %1369 = vmatpush3.bf16.msra.mxu1 %v1400_v41 }
 0x453   : > { %1370 = vmatprep.subr.bf16.mxu1 %v1426_v1 }
 0x456   : > { %1371 = vmatpush3.bf16.msra.mxu1 %v1401_v42 }
 0x457   : > { %1372 = vmatprep.subr.bf16.mxu1 %v1426_v1 }
 0x45a   : > { %1373 = vmatpush3.bf16.msra.mxu1 %v1402_v43 }
 0x45b   : > { %1374 = vmatprep.subr.bf16.mxu1 %v1426_v1 }
 0x45e   : > { %1375 = vmatpush3.bf16.msra.mxu1 %v1403_v44 }
 0x51f   : > { %v889_v9 = vpop.f32.mrb[12].mxu0 }
 0x520   : > { %v1352_v10 = vpop.f32.mrb[13].mxu0  ;;  %v944_v14 = vsel %vm514_vm1, %v889_v9, 0.0 }
 0x521   : > { %v892_v11 = vpop.f32.mrb[14].mxu0 }
 0x522   : > { %v1353_v12 = vpop.f32.mrb[15].mxu0 }
 0x523   : > { %v938_v13 = vpop.f32.mrb[12].mxu1 }
 0x524   : > { %v945_v15 = vsel %vm514_vm1, %v938_v13, 0.0  ;;  %v1358_v17 = vpop.f32.mrb[13].mxu1 }
 0x525   : > { %v946_v18 = vadd.f32 %v945_v15, %v944_v14  ;;  %v941_v19 = vpop.f32.mrb[14].mxu1  ;;  %v1278_v15 = vld [vmem:[%s1672_s12] ss:$0 sm:$0xff] }
 0x526   : > { %v1359_v21 = vpop.f32.mrb[15].mxu1  ;;  %v1279_v17 = vld [vmem:[%s1673_s13] ss:$0 sm:$0xff] }
 0x527   : > { %v954_v22 = vadd.f32 %v1265_v16, %v946_v18 }
 0x529   : > { %v955_v23 = vadd.f32 %v954_v22, %v479_v20 }
 0x52b   : > { %v958_v24 = vsel %vm514_vm1, %v955_v23, 0.0 }
 0x52c   : > { %959 = vadd.xlane.f32.xlu1 %v958_v24 }
 0x5b9   : > { %v960_v25 = vpop.xlane.xlu1 %959 }
 0x5ba   : > { %v962_v26 = vmul.f32 0.03125, %v960_v25 }
 0x5bc   : > { %v963_v27 = vsub.f32 %v955_v23, %v962_v26 }
 0x5be   : > { %v964_v28 = vmul.f32 %v963_v27, %v963_v27 }
 0x5c0   : > { %v965_v29 = vsel %vm514_vm1, %v964_v28, 0.0 }
 0x5c1   : > { %966 = vadd.xlane.f32.xlu0 %v965_v29 }
 0x64e   : > { %v967_v31 = vpop.xlane.xlu0 %966 }
 0x64f   : > { %v968_v32 = vmul.f32 0.03125, %v967_v31 }
 0x651   : > { %v969_v33 = vadd.f32 1e-12, %v968_v32 }
 0x653   : > { %1412 = vrsqrt.f32 %v969_v33 }
 0x65d   : > { %v1413_v34 = vpop.eup %1412 }
 0x65e   : > { %v971_v36 = vmul.f32 %v1413_v34, %v963_v27 }
 0x660   : > { %v978_v38 = vmul.f32 %v1266_v35, %v971_v36 }
 0x662   : > { %v985_v39 = vadd.f32 %v1267_v37, %v978_v38 }
 0x664   : > { %v986_v40 = vpack.c.bf16 %v985_v39, %v985_v39 }
 0x666   : > { %1365 = vmatmul.mubr.msk.bf16.vlgmr.msra.gmra.mrb[16].mxu0 %vm514_vm1, %v986_v40 }
 0x739   : > { %v1047_v46 = vpop.f32.mrb[16].mxu0 }
 0x73a   : > { %v1048_v47 = vadd.f32 %v1268_v45, %v1047_v46  ;;  %v1366_v48 = vpop.f32.mrb[17].mxu0 }
 0x73b   : > { %v1050_v49 = vpop.f32.mrb[18].mxu0 }
 0x73c   : > { %v1053_v50 = vmul.f32 %v1048_v47, %v1048_v47  ;;  %v1367_v51 = vpop.f32.mrb[19].mxu0 }
 0x73e   : > { %v1054_v52 = vmul.f32 %v1053_v50, %v1048_v47 }
 0x740   : > { %v1055_v53 = vmul.f32 0.044715, %v1054_v52 }
 0x742   : > { %v1056_v54 = vadd.f32 %v1055_v53, %v1048_v47 }
 0x744   : > { %v1057_v55 = vmul.f32 0.7978846, %v1056_v54 }
 0x746   : > { %1414 = vtanh.f32 %v1057_v55 }
 0x750   : > { %v1415_v1 = vpop.eup %1414 }
 0x751   : > { %v1059_v56 = vadd.f32 1.0, %v1415_v1 }
 0x753   : > { %v1060_v57 = vmul.f32 0.5, %v1059_v56 }
 0x755   : > { %v1061_v58 = vmul.f32 %v1060_v57, %v1048_v47 }
 0x757   : > { %v1062_v59 = vpack.c.bf16 %v1061_v58, %v1061_v58 }
 0x759   : > { %1377 = vmatmul.mubr.msk.bf16.vlgmr.msra.gmra.mrb[16].mxu1 %vm1102_vm5, %v1062_v59 }
 0x82c   : > { %v1140_v61 = vpop.f32.mrb[16].mxu1 }
 0x82d   : > { %v1141_v62 = vadd.f32 %v1272_v60, %v1140_v61  ;;  %v1378_v63 = vpop.f32.mrb[17].mxu1 }
 0x82e   : > { %v1143_v0 = vpop.f32.mrb[18].mxu1 }
 0x82f   : > { %v1379_v2 = vpop.f32.mrb[19].mxu1  ;;  %v1146_v3 = vadd.f32 %v1141_v62, %v985_v39 }
 0x831   : > { %v1149_v4 = vsel %vm514_vm1, %v1146_v3, 0.0 }
 0x832   : > { %1150 = vadd.xlane.f32.xlu0 %v1149_v4 }
 0x8bf   : > { %v1151_v6 = vpop.xlane.xlu0 %1150 }
 0x8c0   : > { %v1152_v7 = vmul.f32 0.03125, %v1151_v6 }
 0x8c2   : > { %v1153_v8 = vsub.f32 %v1146_v3, %v1152_v7 }
 0x8c4   : > { %v1154_v9 = vmul.f32 %v1153_v8, %v1153_v8 }
 0x8c6   : > { %v1155_v10 = vsel %vm514_vm1, %v1154_v9, 0.0 }
 0x8c7   : > { %1156 = vadd.xlane.f32.xlu0 %v1155_v10 }
 0x954   : > { %v1157_v11 = vpop.xlane.xlu0 %1156 }
 0x955   : > { %v1158_v12 = vmul.f32 0.03125, %v1157_v11 }
 0x957   : > { %v1159_v13 = vadd.f32 1e-12, %v1158_v12 }
 0x959   : > { %1416 = vrsqrt.f32 %v1159_v13 }
 0x963   : > { %v1417_v14 = vpop.eup %1416 }
 0x964   : > { %v1161_v16 = vmul.f32 %v1417_v14, %v1153_v8 }
 0x966   : > { %v1168_v18 = vmul.f32 %v1278_v15, %v1161_v16 }
 0x968   : > { %v1175_v19 = vadd.f32 %v1279_v17, %v1168_v18 }
 0x96a   : > { %v1176_v20 = vpack.c.bf16 %v1175_v19, %v1175_v19 }
 0x96c   : > { %1178 = vst.msk [vmem:[%s476_s15] sm:$0xf] %vm1177_vm6, %v1176_v20 }
 0x96d PF: > { %s24_s29 = sadd.s32 1, %s1424_s29  }
 0x96e   : > { %p21_p4 = scmp.ge.s32.totalorder %s24_s29, 4  }
 0x970   :  { %23 = sbr.rel (!%p21_p4) target bundleno = 1 (0x1), region = 109 }

</bundles_post_ra>
